<compile_context>
chip_gen: v6e
topology: v6e:2x2x1
jax: 0.10.0
libtpu: 0.0.40
codegen_flags: <defaults>
</compile_context>

<pallas_src>
import functools
import math

import jax
import jax.numpy as jnp
from jax.experimental import pallas as pl
from jax.experimental.pallas import tpu as pltpu


# ----------------------------------------------------------------------------
# In-kernel helpers (f32 elementwise math)
# ----------------------------------------------------------------------------
def _layernorm(x, g, b, eps=1e-5):
    mu = jnp.mean(x, axis=-1, keepdims=True)
    d = x - mu
    var = jnp.mean(d * d, axis=-1, keepdims=True)
    return d * jax.lax.rsqrt(var + eps) * g + b


def _gelu_exact(x):
    # PyTorch nn.GELU() default (erf form)
    return 0.5 * x * (1.0 + jax.lax.erf(x * (1.0 / math.sqrt(2.0))))


# ----------------------------------------------------------------------------
# Fused ViT encoder kernel: grid = (batch_blocks, depth)
# ----------------------------------------------------------------------------
def vit_encoder_kernel(x_ref, bid_col_ref, bid_row_ref,
                       ln1g_ref, ln1b_ref, wqkv_ref, wo_ref, bo_ref,
                       ln2g_ref, ln2b_ref, w1_ref, b1_ref, w2_ref, b2_ref,
                       o_ref, carry_ref, *, heads, dim_head, ntok, bt):
    layer = pl.program_id(1)
    n_layers = pl.num_programs(1)
    inner = heads * dim_head
    scale = dim_head ** -0.5
    bf16 = jnp.bfloat16

    # Layer 0: load the batch block (pos-encoding already added in wrapper).
    @pl.when(layer == 0)
    def _():
        carry_ref[...] = x_ref[...].astype(jnp.float32)

    x = carry_ref[...]                                       # (M, D) f32

    # Block-diagonal additive mask, built in-kernel from tiny block-id vectors
    # (no (M, M) HBM input).  Only needed when >1 image is packed per block.
    if bt > 1:
        neg = jnp.where(bid_col_ref[...] == bid_row_ref[...], 0.0, -1e30)
    else:
        neg = 0.0

    # ---------------- pre-norm multi-head self-attention ----------------
    xn = _layernorm(x, ln1g_ref[0], ln1b_ref[0])
    qkv = jnp.dot(xn.astype(bf16), wqkv_ref[0],
                  preferred_element_type=jnp.float32)        # (M, 3*inner) f32
    qkv = qkv.astype(bf16)                                   # cast ONCE

    attn = None
    for h in range(heads):                                   # static unroll
        c = h * dim_head
        q = qkv[:, c:c + dim_head]
        k = qkv[:, inner + c:inner + c + dim_head]
        v = qkv[:, 2 * inner + c:2 * inner + c + dim_head]
        # contract on last dims -> no explicit transpose of k
        s = jax.lax.dot_general(q, k, (((1,), (1,)), ((), ())),
                                preferred_element_type=jnp.float32)
        s = s * scale + neg                                  # block-diag mask
        s = s - jnp.max(s, axis=-1, keepdims=True)
        p = jnp.exp(s)
        p = p * pl.reciprocal(jnp.sum(p, axis=-1, keepdims=True), approx=True)
        o = jnp.dot(p.astype(bf16), v,
                    preferred_element_type=jnp.float32)      # (M, Dh) f32
        # concat(o_h) @ Wo  ==  sum_h o_h @ Wo[h]  (no lane concat needed)
        contrib = jnp.dot(o.astype(bf16), wo_ref[0, h],
                          preferred_element_type=jnp.float32)
        attn = contrib if attn is None else attn + contrib
    x = x + attn + bo_ref[0]                                 # residual

    # ---------------- pre-norm MLP ----------------
    xn2 = _layernorm(x, ln2g_ref[0], ln2b_ref[0])
    h1 = jnp.dot(xn2.astype(bf16), w1_ref[0],
                 preferred_element_type=jnp.float32) + b1_ref[0]
    h1 = _gelu_exact(h1)                                     # f32 math
    h2 = jnp.dot(h1.astype(bf16), w2_ref[0],                 # bf16 MXU operand
                 preferred_element_type=jnp.float32) + b2_ref[0]
    x = x + h2                                               # residual

    carry_ref[...] = x                                       # carry to next layer

    # Emit ONLY the cls rows (token 0 of each image) at the last layer.
    @pl.when(layer == n_layers - 1)
    def _():
        for r in range(bt):                                  # static, bt small
            o_ref[0, r:r + 1, :] = x[r * ntok:r * ntok + 1, :].astype(o_ref.dtype)


# ----------------------------------------------------------------------------
# Generation-aware sizing helpers
# ----------------------------------------------------------------------------
def _tpu_vmem_capacity():
    try:
        info = pltpu.get_tpu_info()
        cap = int(getattr(info, "vmem_capacity_bytes", 0) or 0)
        if cap > 0:
            return cap
    except Exception:
        pass
    return 64 << 20   # conservative default (v7x-sized)


def _vmem_need_bytes(bt, ntok, d, inner, mlp_dim):
    """Rough per-grid-step VMEM footprint, including in-kernel temps."""
    M = bt * ntok
    weight_blk = ((d * 3 * inner + inner * d + 2 * d * mlp_dim) * 2
                  + (6 * d + mlp_dim) * 4)
    # double-buffered input streams + tiny block-id vectors + output blocks
    streams = 2 * (M * d * 4 + weight_blk + (M * 128 + 8 * M) * 4) + 2 * (bt * d * 4)
    carry = M * d * 4
    temps = (3 * M * d * 4            # xn, attn acc, x value
             + M * 3 * inner * 6      # qkv f32 transient + bf16 retained
             + 2 * M * M * 4          # per-head scores / probs
             + M * mlp_dim * 4)       # h1
    return streams + carry + temps


def _pick_batch_tile(batch, ntok, d, inner, mlp_dim, vmem_cap):
    """Choose images-per-block.  Legality: block rows (bt*ntok) must be a
    multiple of 8 or cover the whole flattened array."""
    legal = [bt for bt in range(1, batch + 1)
             if batch % bt == 0 and ((bt * ntok) % 8 == 0 or bt == batch)]
    budget = int(0.70 * vmem_cap)
    fitting = [bt for bt in legal
               if _vmem_need_bytes(bt, ntok, d, inner, mlp_dim) <= budget]
    if not fitting:
        fitting = legal[:1]           # smallest legal block
    if vmem_cap <= (80 << 20):
        # v7x-like (64 MiB / 2 TCs): keep >= 2 parallel batch blocks if possible
        multi = [bt for bt in fitting if batch // bt >= 2]
        if multi:
            return max(multi)
    # v5e / v6e (128 MiB, 1 TC): largest block that fits -> fewest weight
    # re-streams and best per-step overhead amortization.
    return max(fitting)


# ----------------------------------------------------------------------------
# Wrapper
# ----------------------------------------------------------------------------
def vit_unit_forward(x, cls_token, pe, layers, *, heads, dim_head):
    """x: (B, num_patches, hidden_dim) -> (B, hidden_dim)."""
    B, n, D = x.shape
    ntok = n + 1
    depth = len(layers)
    inner = heads * dim_head
    mlp_dim = layers[0]["w1"].shape[-1]
    f32, bf16 = jnp.float32, jnp.bfloat16

    # cls token prepend (pack([cls_tokens, x], 'b * d')) + positional encoding
    # (fused host-side into the concat; dropout is identity in eval mode).
    cls_tokens = jnp.broadcast_to(cls_token[None, None, :], (B, 1, D))
    x_emb = jnp.concatenate([cls_tokens, x], axis=1)          # (B, ntok, D)
    x_emb = x_emb + pe[None, :ntok, :].astype(x_emb.dtype)

    vmem_cap = _tpu_vmem_capacity()
    bt = _pick_batch_tile(B, ntok, D, inner, mlp_dim, vmem_cap)
    n_blocks = B // bt
    M = bt * ntok

    x_flat = x_emb.reshape(B * ntok, D).astype(f32)
    # tiny block-id vectors (replace the old (M, M) mask input)
    bid = (jnp.arange(M, dtype=jnp.int32) // ntok).astype(f32)
    bid_col = bid.reshape(M, 1)
    bid_row = bid.reshape(1, M)

    # Stack layer params over depth; MXU weights in bf16, LN/bias in f32.
    ln1g = jnp.stack([l["ln1g"] for l in layers]).astype(f32)            # (L,1,D)
    ln1b = jnp.stack([l["ln1b"] for l in layers]).astype(f32)
    wqkv = jnp.stack([l["wqkv"] for l in layers]).astype(bf16)           # (L,D,3I)
    wo = jnp.stack([l["wo"].reshape(heads, dim_head, D)
                    for l in layers]).astype(bf16)                       # (L,H,Dh,D)
    bo = jnp.stack([l["bo"] for l in layers]).astype(f32)
    ln2g = jnp.stack([l["ln2g"] for l in layers]).astype(f32)
    ln2b = jnp.stack([l["ln2b"] for l in layers]).astype(f32)
    w1 = jnp.stack([l["w1"] for l in layers]).astype(bf16)               # (L,D,F)
    b1 = jnp.stack([l["b1"] for l in layers]).astype(f32)
    w2 = jnp.stack([l["w2"] for l in layers]).astype(bf16)               # (L,F,D)
    b2 = jnp.stack([l["b2"] for l in layers]).astype(f32)

    # Advisory cost estimate.
    flops_blk = (2 * M * D * 3 * inner                     # qkv proj
                 + heads * 2 * (2 * M * M * dim_head)      # scores + p@v
                 + heads * (2 * M * dim_head * D)          # out proj
                 + 2 * (2 * M * D * mlp_dim))              # mlp
    flops = int(depth * n_blocks * flops_blk)
    transc = int(depth * n_blocks * (heads * M * M + M * mlp_dim + 2 * M))
    weight_bytes = depth * ((D * 3 * inner + inner * D + 2 * D * mlp_dim) * 2
                            + (6 * D + mlp_dim) * 4)
    bytes_acc = int(B * ntok * D * 4 + n_blocks * weight_bytes
                    + B * D * 4 + 2 * M * 4)

    # Explicit VMEM budget: realistic need (incl. temps) with headroom,
    # capped at ~75% of physical VMEM for this generation.
    need = _vmem_need_bytes(bt, ntok, D, inner, mlp_dim)
    vmem_limit = int(min(max(need + (8 << 20), 32 << 20), int(0.75 * vmem_cap)))

    grid = (n_blocks, depth)
    wspec = lambda shp: pl.BlockSpec(shp, lambda i, l: (l,) + (0,) * (len(shp) - 1))

    out_cls = pl.pallas_call(
        functools.partial(vit_encoder_kernel, heads=heads, dim_head=dim_head,
                          ntok=ntok, bt=bt),
        out_shape=jax.ShapeDtypeStruct((n_blocks, bt, D), x.dtype),
        grid=grid,
        in_specs=[
            pl.BlockSpec((M, D), lambda i, l: (i, 0)),        # x (resident over depth)
            pl.BlockSpec((M, 1), lambda i, l: (0, 0)),        # row block ids
            pl.BlockSpec((1, M), lambda i, l: (0, 0)),        # col block ids
            wspec((1, 1, D)),                                 # ln1g
            wspec((1, 1, D)),                                 # ln1b
            wspec((1, D, 3 * inner)),                         # wqkv
            wspec((1, heads, dim_head, D)),                   # wo (per-head slabs)
            wspec((1, 1, D)),                                 # bo
            wspec((1, 1, D)),                                 # ln2g
            wspec((1, 1, D)),                                 # ln2b
            wspec((1, D, mlp_dim)),                           # w1
            wspec((1, 1, mlp_dim)),                           # b1
            wspec((1, mlp_dim, D)),                           # w2
            wspec((1, 1, D)),                                 # b2
        ],
        out_specs=pl.BlockSpec((1, bt, D), lambda i, l: (i, 0, 0)),
        scratch_shapes=[pltpu.VMEM((M, D), jnp.float32)],     # cross-layer carry
        compiler_params=pltpu.CompilerParams(
            dimension_semantics=("parallel", "arbitrary"),
            vmem_limit_bytes=vmem_limit),
        cost_estimate=pl.CostEstimate(flops=flops, transcendentals=transc,
                                      bytes_accessed=bytes_acc),
    )(x_flat, bid_col, bid_row, ln1g, ln1b, wqkv, wo, bo,
      ln2g, ln2b, w1, b1, w2, b2)

    # (n_blocks, bt, D) -> (B, D); block i row r is image i*bt + r
    cls_out = out_cls.reshape(B, D)
    return cls_out.reshape(cls_out.shape[0], -1)


# ----------------------------------------------------------------------------
# Parameter construction (matches the PyTorch module structure)
# ----------------------------------------------------------------------------
def sinusoidal_pos_encoding(max_len, d_model, dtype=jnp.float32):
    position = jnp.arange(max_len, dtype=jnp.float32)[:, None]
    div_term = jnp.exp(jnp.arange(0, d_model, 2, dtype=jnp.float32)
                       * (-math.log(10000.0) / d_model))
    pe = jnp.zeros((max_len, d_model), dtype=jnp.float32)
    pe = pe.at[:, 0::2].set(jnp.sin(position * div_term))
    pe = pe.at[:, 1::2].set(jnp.cos(position * div_term))
    return pe.astype(dtype)


def init_params(key, hidden_dim, depth, heads, dim_head, mlp_dim):
    inner = heads * dim_head
    layers = []
    for _ in range(depth):
        keys = jax.random.split(key, 5)
        key = keys[0]
        layer = dict(
            ln1g=jnp.ones((1, hidden_dim), jnp.float32),
            ln1b=jnp.zeros((1, hidden_dim), jnp.float32),
            wqkv=0.02 * jax.random.normal(keys[1], (hidden_dim, 3 * inner), jnp.float32),
            wo=0.02 * jax.random.normal(keys[2], (inner, hidden_dim), jnp.float32),
            bo=jnp.zeros((1, hidden_dim), jnp.float32),
            ln2g=jnp.ones((1, hidden_dim), jnp.float32),
            ln2b=jnp.zeros((1, hidden_dim), jnp.float32),
            w1=0.02 * jax.random.normal(keys[3], (hidden_dim, mlp_dim), jnp.float32),
            b1=jnp.zeros((1, mlp_dim), jnp.float32),
            w2=0.02 * jax.random.normal(keys[4], (mlp_dim, hidden_dim), jnp.float32),
            b2=jnp.zeros((1, hidden_dim), jnp.float32),
        )
        layers.append(layer)
    return layers, key


# ----------------------------------------------------------------------------
if __name__ == "__main__":
    # Small config consistent with the module's constructor
    hidden_dim = 32
    num_patches = 8
    depth = 2
    heads = 2
    dim_head = 16
    mlp_dim = 64
    batch = 2

    key = jax.random.PRNGKey(0)
    key, k_x, k_cls = jax.random.split(key, 3)

    x = jax.random.normal(k_x, (batch, num_patches, hidden_dim), jnp.float32)
    cls_token = jax.random.normal(k_cls, (hidden_dim,), jnp.float32)
    pe = sinusoidal_pos_encoding(num_patches + 1, hidden_dim)
    layers, _ = init_params(key, hidden_dim, depth, heads, dim_head, mlp_dim)

    out = vit_unit_forward(x, cls_token, pe, layers,
                           heads=heads, dim_head=dim_head)
    out = jax.block_until_ready(out)
    assert out.shape == (batch, hidden_dim), out.shape
    assert bool(jnp.all(jnp.isfinite(out)))
    # TODO(synk): dropout is identity here (eval-mode forward); training-mode
    # dropout would need pltpu.prng_* inside the kernel.
    print("KERNEL_OK")
</pallas_src>

<mosaic_0001>
module attributes {stable_mosaic.version = 11 : i64} {
  func.func @vit_encoder_kernel(%arg0: i32, %arg1: i32, %arg2: memref<18x32xf32, #tpu.memory_space<vmem>>, %arg3: memref<18x1xf32, #tpu.memory_space<vmem>>, %arg4: memref<1x18xf32, #tpu.memory_space<vmem>>, %arg5: memref<1x1x32xf32, #tpu.memory_space<vmem>>, %arg6: memref<1x1x32xf32, #tpu.memory_space<vmem>>, %arg7: memref<1x32x96xbf16, #tpu.memory_space<vmem>>, %arg8: memref<1x2x16x32xbf16, #tpu.memory_space<vmem>>, %arg9: memref<1x1x32xf32, #tpu.memory_space<vmem>>, %arg10: memref<1x1x32xf32, #tpu.memory_space<vmem>>, %arg11: memref<1x1x32xf32, #tpu.memory_space<vmem>>, %arg12: memref<1x32x64xbf16, #tpu.memory_space<vmem>>, %arg13: memref<1x1x64xf32, #tpu.memory_space<vmem>>, %arg14: memref<1x64x32xbf16, #tpu.memory_space<vmem>>, %arg15: memref<1x1x32xf32, #tpu.memory_space<vmem>>, %arg16: memref<1x2x32xf32, #tpu.memory_space<vmem>>, %arg17: memref<18x32xf32, #tpu.memory_space<vmem>>) attributes {dimension_semantics = [#tpu.dimension_semantics<parallel>, #tpu.dimension_semantics<arbitrary>], iteration_bounds = array<i64: 1, 2>, scalar_prefetch = 0 : i64, scratch_operands = 1 : i64, tpu.core_type = #tpu.core_type<tc>, window_params = [{transform_indices = @transform_0, window_bounds = array<i64: 18, 32>}, {pipeline_mode = #tpu.pipeline_mode<synchronous>, transform_indices = @transform_1, window_bounds = array<i64: 18, 1>}, {pipeline_mode = #tpu.pipeline_mode<synchronous>, transform_indices = @transform_2, window_bounds = array<i64: 1, 18>}, {transform_indices = @transform_3, window_bounds = array<i64: 1, 1, 32>}, {transform_indices = @transform_4, window_bounds = array<i64: 1, 1, 32>}, {transform_indices = @transform_5, window_bounds = array<i64: 1, 32, 96>}, {transform_indices = @transform_6, window_bounds = array<i64: 1, 2, 16, 32>}, {transform_indices = @transform_7, window_bounds = array<i64: 1, 1, 32>}, {transform_indices = @transform_8, window_bounds = array<i64: 1, 1, 32>}, {transform_indices = @transform_9, window_bounds = array<i64: 1, 1, 32>}, {transform_indices = @transform_10, window_bounds = array<i64: 1, 32, 64>}, {transform_indices = @transform_11, window_bounds = array<i64: 1, 1, 64>}, {transform_indices = @transform_12, window_bounds = array<i64: 1, 64, 32>}, {transform_indices = @transform_13, window_bounds = array<i64: 1, 1, 32>}, {transform_indices = @transform_14, window_bounds = array<i64: 1, 2, 32>}]} {
    %c0_i32 = arith.constant 0 : i32
    %0 = arith.cmpi eq, %arg1, %c0_i32 : i32
    %1 = arith.extui %0 : i1 to i32
    %c0_i32_0 = arith.constant 0 : i32
    %2 = arith.cmpi ne, %1, %c0_i32_0 : i32
    scf.if %2 {
      %c0_75 = arith.constant 0 : index
      %c0_76 = arith.constant 0 : index
      %146 = vector.load %arg2[%c0_75, %c0_76] : memref<18x32xf32, #tpu.memory_space<vmem>>, vector<18x32xf32>
      %c0_77 = arith.constant 0 : index
      %c0_78 = arith.constant 0 : index
      %147 = vector.load %arg17[%c0_77, %c0_78] : memref<18x32xf32, #tpu.memory_space<vmem>>, vector<18x32xf32>
      tpu.vector_store %arg17[%c0_77, %c0_78], %146 {strides = array<i32>} : memref<18x32xf32, #tpu.memory_space<vmem>>, vector<18x32xf32>,
    } else {
    }
    %c0 = arith.constant 0 : index
    %c0_1 = arith.constant 0 : index
    %3 = vector.load %arg17[%c0, %c0_1] : memref<18x32xf32, #tpu.memory_space<vmem>>, vector<18x32xf32>
    %c0_2 = arith.constant 0 : index
    %c0_3 = arith.constant 0 : index
    %4 = vector.load %arg3[%c0_2, %c0_3] : memref<18x1xf32, #tpu.memory_space<vmem>>, vector<18x1xf32>
    %c0_4 = arith.constant 0 : index
    %c0_5 = arith.constant 0 : index
    %5 = vector.load %arg4[%c0_4, %c0_5] : memref<1x18xf32, #tpu.memory_space<vmem>>, vector<1x18xf32>
    %6 = vector.broadcast %4 : vector<18x1xf32> to vector<18x18xf32>
    %7 = vector.broadcast %5 : vector<1x18xf32> to vector<18x18xf32>
    %8 = arith.cmpf oeq, %6, %7 : vector<18x18xf32>
    %cst = arith.constant 0.000000e+00 : f32
    %cst_6 = arith.constant -1.000000e+30 : f32
    %9 = vector.broadcast %cst : f32 to vector<18x18xf32>
    %10 = vector.broadcast %cst_6 : f32 to vector<18x18xf32>
    %11 = arith.select %8, %9, %10 : vector<18x18xi1>, vector<18x18xf32>
    %c0_7 = arith.constant 0 : index
    %c0_8 = arith.constant 0 : index
    %c0_9 = arith.constant 0 : index
    %12 = vector.load %arg5[%c0_7, %c0_8, %c0_9] : memref<1x1x32xf32, #tpu.memory_space<vmem>>, vector<1x1x32xf32>
    %13 = vector.shape_cast %12 : vector<1x1x32xf32> to vector<1x32xf32>
    %c0_10 = arith.constant 0 : index
    %c0_11 = arith.constant 0 : index
    %c0_12 = arith.constant 0 : index
    %14 = vector.load %arg6[%c0_10, %c0_11, %c0_12] : memref<1x1x32xf32, #tpu.memory_space<vmem>>, vector<1x1x32xf32>
    %15 = vector.shape_cast %14 : vector<1x1x32xf32> to vector<1x32xf32>
    %cst_13 = arith.constant dense<0.000000e+00> : vector<18xf32>
    %16 = vector.multi_reduction <add>, %3, %cst_13 [1] : vector<18x32xf32> to vector<18xf32>
    %17 = vector.shape_cast %16 : vector<18xf32> to vector<18x1xf32>
    %cst_14 = arith.constant 3.200000e+01 : f32
    %18 = vector.broadcast %cst_14 : f32 to vector<18x1xf32>
    %19 = arith.divf %17, %18 : vector<18x1xf32>
    %20 = vector.broadcast %19 : vector<18x1xf32> to vector<18x32xf32>
    %21 = arith.subf %3, %20 : vector<18x32xf32>
    %22 = arith.mulf %21, %21 : vector<18x32xf32>
    %cst_15 = arith.constant dense<0.000000e+00> : vector<18xf32>
    %23 = vector.multi_reduction <add>, %22, %cst_15 [1] : vector<18x32xf32> to vector<18xf32>
    %24 = vector.shape_cast %23 : vector<18xf32> to vector<18x1xf32>
    %cst_16 = arith.constant 3.200000e+01 : f32
    %25 = vector.broadcast %cst_16 : f32 to vector<18x1xf32>
    %26 = arith.divf %24, %25 : vector<18x1xf32>
    %cst_17 = arith.constant 9.99999974E-6 : f32
    %27 = vector.broadcast %cst_17 : f32 to vector<18x1xf32>
    %28 = arith.addf %26, %27 : vector<18x1xf32>
    %29 = math.rsqrt %28 : vector<18x1xf32>
    %30 = vector.broadcast %29 : vector<18x1xf32> to vector<18x32xf32>
    %31 = arith.mulf %21, %30 : vector<18x32xf32>
    %32 = vector.broadcast %13 : vector<1x32xf32> to vector<18x32xf32>
    %33 = arith.mulf %31, %32 : vector<18x32xf32>
    %34 = vector.broadcast %15 : vector<1x32xf32> to vector<18x32xf32>
    %35 = arith.addf %33, %34 : vector<18x32xf32>
    %36 = arith.truncf %35 : vector<18x32xf32> to vector<18x32xbf16>
    %c0_18 = arith.constant 0 : index
    %c0_19 = arith.constant 0 : index
    %c0_20 = arith.constant 0 : index
    %37 = vector.load %arg7[%c0_18, %c0_19, %c0_20] : memref<1x32x96xbf16, #tpu.memory_space<vmem>>, vector<1x32x96xbf16>
    %38 = vector.shape_cast %37 : vector<1x32x96xbf16> to vector<32x96xbf16>
    %cst_21 = arith.constant dense<0.000000e+00> : vector<18x96xf32>
    %39 = tpu.matmul %36, %38, %cst_21 {dimension_numbers = #tpu.dot_dimension_numbers<[1], [0], [0], [1], [0, 0, 1, 1], [], []>} : vector<18x32xbf16>, vector<32x96xbf16>, vector<18x96xf32> -> vector<18x96xf32>
    %40 = arith.truncf %39 : vector<18x96xf32> to vector<18x96xbf16>
    %41 = vector.extract_strided_slice %40 {offsets = [0, 0], sizes = [18, 16], strides = [1, 1]} : vector<18x96xbf16> to vector<18x16xbf16>
    %42 = vector.extract_strided_slice %40 {offsets = [0, 32], sizes = [18, 16], strides = [1, 1]} : vector<18x96xbf16> to vector<18x16xbf16>
    %43 = vector.extract_strided_slice %40 {offsets = [0, 64], sizes = [18, 16], strides = [1, 1]} : vector<18x96xbf16> to vector<18x16xbf16>
    %cst_22 = arith.constant dense<0.000000e+00> : vector<18x18xf32>
    %44 = tpu.matmul %41, %42, %cst_22 {dimension_numbers = #tpu.dot_dimension_numbers<[1], [1], [0], [0], [0, 0, 1, 0], [], []>} : vector<18x16xbf16>, vector<18x16xbf16>, vector<18x18xf32> -> vector<18x18xf32>
    %cst_23 = arith.constant 2.500000e-01 : f32
    %45 = vector.broadcast %cst_23 : f32 to vector<18x18xf32>
    %46 = arith.mulf %44, %45 : vector<18x18xf32>
    %47 = arith.addf %46, %11 : vector<18x18xf32>
    %cst_24 = arith.constant dense<0xFF800000> : vector<18xf32>
    %48 = vector.multi_reduction <maximumf>, %47, %cst_24 [1] : vector<18x18xf32> to vector<18xf32>
    %49 = vector.shape_cast %48 : vector<18xf32> to vector<18x1xf32>
    %50 = vector.broadcast %49 : vector<18x1xf32> to vector<18x18xf32>
    %51 = arith.subf %47, %50 : vector<18x18xf32>
    %52 = math.exp %51 : vector<18x18xf32>
    %cst_25 = arith.constant dense<0.000000e+00> : vector<18xf32>
    %53 = vector.multi_reduction <add>, %52, %cst_25 [1] : vector<18x18xf32> to vector<18xf32>
    %54 = vector.shape_cast %53 : vector<18xf32> to vector<18x1xf32>
    %55 = tpu.reciprocal %54 {approx = true} : vector<18x1xf32> -> vector<18x1xf32>
    %56 = vector.broadcast %55 : vector<18x1xf32> to vector<18x18xf32>
    %57 = arith.mulf %52, %56 : vector<18x18xf32>
    %58 = arith.truncf %57 : vector<18x18xf32> to vector<18x18xbf16>
    %cst_26 = arith.constant dense<0.000000e+00> : vector<18x16xf32>
    %59 = tpu.matmul %58, %43, %cst_26 {dimension_numbers = #tpu.dot_dimension_numbers<[1], [0], [0], [1], [0, 0, 1, 1], [], []>} : vector<18x18xbf16>, vector<18x16xbf16>, vector<18x16xf32> -> vector<18x16xf32>
    %60 = arith.truncf %59 : vector<18x16xf32> to vector<18x16xbf16>
    %c0_27 = arith.constant 0 : index
    %c0_28 = arith.constant 0 : index
    %c0_29 = arith.constant 0 : index
    %c0_30 = arith.constant 0 : index
    %61 = vector.load %arg8[%c0_27, %c0_28, %c0_29, %c0_30] : memref<1x2x16x32xbf16, #tpu.memory_space<vmem>>, vector<1x1x16x32xbf16>
    %62 = vector.shape_cast %61 : vector<1x1x16x32xbf16> to vector<16x32xbf16>
    %cst_31 = arith.constant dense<0.000000e+00> : vector<18x32xf32>
    %63 = tpu.matmul %60, %62, %cst_31 {dimension_numbers = #tpu.dot_dimension_numbers<[1], [0], [0], [1], [0, 0, 1, 1], [], []>} : vector<18x16xbf16>, vector<16x32xbf16>, vector<18x32xf32> -> vector<18x32xf32>
    %64 = vector.extract_strided_slice %40 {offsets = [0, 16], sizes = [18, 16], strides = [1, 1]} : vector<18x96xbf16> to vector<18x16xbf16>
    %65 = vector.extract_strided_slice %40 {offsets = [0, 48], sizes = [18, 16], strides = [1, 1]} : vector<18x96xbf16> to vector<18x16xbf16>
    %66 = vector.extract_strided_slice %40 {offsets = [0, 80], sizes = [18, 16], strides = [1, 1]} : vector<18x96xbf16> to vector<18x16xbf16>
    %cst_32 = arith.constant dense<0.000000e+00> : vector<18x18xf32>
    %67 = tpu.matmul %64, %65, %cst_32 {dimension_numbers = #tpu.dot_dimension_numbers<[1], [1], [0], [0], [0, 0, 1, 0], [], []>} : vector<18x16xbf16>, vector<18x16xbf16>, vector<18x18xf32> -> vector<18x18xf32>
    %cst_33 = arith.constant 2.500000e-01 : f32
    %68 = vector.broadcast %cst_33 : f32 to vector<18x18xf32>
    %69 = arith.mulf %67, %68 : vector<18x18xf32>
    %70 = arith.addf %69, %11 : vector<18x18xf32>
    %cst_34 = arith.constant dense<0xFF800000> : vector<18xf32>
    %71 = vector.multi_reduction <maximumf>, %70, %cst_34 [1] : vector<18x18xf32> to vector<18xf32>
    %72 = vector.shape_cast %71 : vector<18xf32> to vector<18x1xf32>
    %73 = vector.broadcast %72 : vector<18x1xf32> to vector<18x18xf32>
    %74 = arith.subf %70, %73 : vector<18x18xf32>
    %75 = math.exp %74 : vector<18x18xf32>
    %cst_35 = arith.constant dense<0.000000e+00> : vector<18xf32>
    %76 = vector.multi_reduction <add>, %75, %cst_35 [1] : vector<18x18xf32> to vector<18xf32>
    %77 = vector.shape_cast %76 : vector<18xf32> to vector<18x1xf32>
    %78 = tpu.reciprocal %77 {approx = true} : vector<18x1xf32> -> vector<18x1xf32>
    %79 = vector.broadcast %78 : vector<18x1xf32> to vector<18x18xf32>
    %80 = arith.mulf %75, %79 : vector<18x18xf32>
    %81 = arith.truncf %80 : vector<18x18xf32> to vector<18x18xbf16>
    %cst_36 = arith.constant dense<0.000000e+00> : vector<18x16xf32>
    %82 = tpu.matmul %81, %66, %cst_36 {dimension_numbers = #tpu.dot_dimension_numbers<[1], [0], [0], [1], [0, 0, 1, 1], [], []>} : vector<18x18xbf16>, vector<18x16xbf16>, vector<18x16xf32> -> vector<18x16xf32>
    %83 = arith.truncf %82 : vector<18x16xf32> to vector<18x16xbf16>
    %c0_37 = arith.constant 0 : index
    %c1 = arith.constant 1 : index
    %c0_38 = arith.constant 0 : index
    %c0_39 = arith.constant 0 : index
    %84 = vector.load %arg8[%c0_37, %c1, %c0_38, %c0_39] : memref<1x2x16x32xbf16, #tpu.memory_space<vmem>>, vector<1x1x16x32xbf16>
    %85 = vector.shape_cast %84 : vector<1x1x16x32xbf16> to vector<16x32xbf16>
    %cst_40 = arith.constant dense<0.000000e+00> : vector<18x32xf32>
    %86 = tpu.matmul %83, %85, %cst_40 {dimension_numbers = #tpu.dot_dimension_numbers<[1], [0], [0], [1], [0, 0, 1, 1], [], []>} : vector<18x16xbf16>, vector<16x32xbf16>, vector<18x32xf32> -> vector<18x32xf32>
    %87 = arith.addf %63, %86 : vector<18x32xf32>
    %88 = arith.addf %3, %87 : vector<18x32xf32>
    %c0_41 = arith.constant 0 : index
    %c0_42 = arith.constant 0 : index
    %c0_43 = arith.constant 0 : index
    %89 = vector.load %arg9[%c0_41, %c0_42, %c0_43] : memref<1x1x32xf32, #tpu.memory_space<vmem>>, vector<1x1x32xf32>
    %90 = vector.shape_cast %89 : vector<1x1x32xf32> to vector<1x32xf32>
    %91 = vector.broadcast %90 : vector<1x32xf32> to vector<18x32xf32>
    %92 = arith.addf %88, %91 : vector<18x32xf32>
    %c0_44 = arith.constant 0 : index
    %c0_45 = arith.constant 0 : index
    %c0_46 = arith.constant 0 : index
    %93 = vector.load %arg10[%c0_44, %c0_45, %c0_46] : memref<1x1x32xf32, #tpu.memory_space<vmem>>, vector<1x1x32xf32>
    %94 = vector.shape_cast %93 : vector<1x1x32xf32> to vector<1x32xf32>
    %c0_47 = arith.constant 0 : index
    %c0_48 = arith.constant 0 : index
    %c0_49 = arith.constant 0 : index
    %95 = vector.load %arg11[%c0_47, %c0_48, %c0_49] : memref<1x1x32xf32, #tpu.memory_space<vmem>>, vector<1x1x32xf32>
    %96 = vector.shape_cast %95 : vector<1x1x32xf32> to vector<1x32xf32>
    %cst_50 = arith.constant dense<0.000000e+00> : vector<18xf32>
    %97 = vector.multi_reduction <add>, %92, %cst_50 [1] : vector<18x32xf32> to vector<18xf32>
    %98 = vector.shape_cast %97 : vector<18xf32> to vector<18x1xf32>
    %cst_51 = arith.constant 3.200000e+01 : f32
    %99 = vector.broadcast %cst_51 : f32 to vector<18x1xf32>
    %100 = arith.divf %98, %99 : vector<18x1xf32>
    %101 = vector.broadcast %100 : vector<18x1xf32> to vector<18x32xf32>
    %102 = arith.subf %92, %101 : vector<18x32xf32>
    %103 = arith.mulf %102, %102 : vector<18x32xf32>
    %cst_52 = arith.constant dense<0.000000e+00> : vector<18xf32>
    %104 = vector.multi_reduction <add>, %103, %cst_52 [1] : vector<18x32xf32> to vector<18xf32>
    %105 = vector.shape_cast %104 : vector<18xf32> to vector<18x1xf32>
    %cst_53 = arith.constant 3.200000e+01 : f32
    %106 = vector.broadcast %cst_53 : f32 to vector<18x1xf32>
    %107 = arith.divf %105, %106 : vector<18x1xf32>
    %cst_54 = arith.constant 9.99999974E-6 : f32
    %108 = vector.broadcast %cst_54 : f32 to vector<18x1xf32>
    %109 = arith.addf %107, %108 : vector<18x1xf32>
    %110 = math.rsqrt %109 : vector<18x1xf32>
    %111 = vector.broadcast %110 : vector<18x1xf32> to vector<18x32xf32>
    %112 = arith.mulf %102, %111 : vector<18x32xf32>
    %113 = vector.broadcast %94 : vector<1x32xf32> to vector<18x32xf32>
    %114 = arith.mulf %112, %113 : vector<18x32xf32>
    %115 = vector.broadcast %96 : vector<1x32xf32> to vector<18x32xf32>
    %116 = arith.addf %114, %115 : vector<18x32xf32>
    %117 = arith.truncf %116 : vector<18x32xf32> to vector<18x32xbf16>
    %c0_55 = arith.constant 0 : index
    %c0_56 = arith.constant 0 : index
    %c0_57 = arith.constant 0 : index
    %118 = vector.load %arg12[%c0_55, %c0_56, %c0_57] : memref<1x32x64xbf16, #tpu.memory_space<vmem>>, vector<1x32x64xbf16>
    %119 = vector.shape_cast %118 : vector<1x32x64xbf16> to vector<32x64xbf16>
    %cst_58 = arith.constant dense<0.000000e+00> : vector<18x64xf32>
    %120 = tpu.matmul %117, %119, %cst_58 {dimension_numbers = #tpu.dot_dimension_numbers<[1], [0], [0], [1], [0, 0, 1, 1], [], []>} : vector<18x32xbf16>, vector<32x64xbf16>, vector<18x64xf32> -> vector<18x64xf32>
    %c0_59 = arith.constant 0 : index
    %c0_60 = arith.constant 0 : index
    %c0_61 = arith.constant 0 : index
    %121 = vector.load %arg13[%c0_59, %c0_60, %c0_61] : memref<1x1x64xf32, #tpu.memory_space<vmem>>, vector<1x1x64xf32>
    %122 = vector.shape_cast %121 : vector<1x1x64xf32> to vector<1x64xf32>
    %123 = vector.broadcast %122 : vector<1x64xf32> to vector<18x64xf32>
    %124 = arith.addf %120, %123 : vector<18x64xf32>
    %cst_62 = arith.constant 5.000000e-01 : f32
    %125 = vector.broadcast %cst_62 : f32 to vector<18x64xf32>
    %126 = arith.mulf %125, %124 : vector<18x64xf32>
    %cst_63 = arith.constant 0.707106769 : f32
    %127 = vector.broadcast %cst_63 : f32 to vector<18x64xf32>
    %128 = arith.mulf %124, %127 : vector<18x64xf32>
    %129 = math.erf %128 : vector<18x64xf32>
    %cst_64 = arith.constant 1.000000e+00 : f32
    %130 = vector.broadcast %cst_64 : f32 to vector<18x64xf32>
    %131 = arith.addf %130, %129 : vector<18x64xf32>
    %132 = arith.mulf %126, %131 : vector<18x64xf32>
    %133 = arith.truncf %132 : vector<18x64xf32> to vector<18x64xbf16>
    %c0_65 = arith.constant 0 : index
    %c0_66 = arith.constant 0 : index
    %c0_67 = arith.constant 0 : index
    %134 = vector.load %arg14[%c0_65, %c0_66, %c0_67] : memref<1x64x32xbf16, #tpu.memory_space<vmem>>, vector<1x64x32xbf16>
    %135 = vector.shape_cast %134 : vector<1x64x32xbf16> to vector<64x32xbf16>
    %cst_68 = arith.constant dense<0.000000e+00> : vector<18x32xf32>
    %136 = tpu.matmul %133, %135, %cst_68 {dimension_numbers = #tpu.dot_dimension_numbers<[1], [0], [0], [1], [0, 0, 1, 1], [], []>} : vector<18x64xbf16>, vector<64x32xbf16>, vector<18x32xf32> -> vector<18x32xf32>
    %c0_69 = arith.constant 0 : index
    %c0_70 = arith.constant 0 : index
    %c0_71 = arith.constant 0 : index
    %137 = vector.load %arg15[%c0_69, %c0_70, %c0_71] : memref<1x1x32xf32, #tpu.memory_space<vmem>>, vector<1x1x32xf32>
    %138 = vector.shape_cast %137 : vector<1x1x32xf32> to vector<1x32xf32>
    %139 = vector.broadcast %138 : vector<1x32xf32> to vector<18x32xf32>
    %140 = arith.addf %136, %139 : vector<18x32xf32>
    %141 = arith.addf %92, %140 : vector<18x32xf32>
    %c0_72 = arith.constant 0 : index
    %c0_73 = arith.constant 0 : index
    %142 = vector.load %arg17[%c0_72, %c0_73] : memref<18x32xf32, #tpu.memory_space<vmem>>, vector<18x32xf32>
    tpu.vector_store %arg17[%c0_72, %c0_73], %141 {strides = array<i32>} : memref<18x32xf32, #tpu.memory_space<vmem>>, vector<18x32xf32>,
    %c1_i32 = arith.constant 1 : i32
    %143 = arith.cmpi eq, %arg1, %c1_i32 : i32
    %144 = arith.extui %143 : i1 to i32
    %c0_i32_74 = arith.constant 0 : i32
    %145 = arith.cmpi ne, %144, %c0_i32_74 : i32
    scf.if %145 {
      %146 = vector.extract_strided_slice %141 {offsets = [0, 0], sizes = [1, 32], strides = [1, 1]} : vector<18x32xf32> to vector<1x32xf32>
      %c0_75 = arith.constant 0 : index
      %c0_76 = arith.constant 0 : index
      %c0_77 = arith.constant 0 : index
      %147 = vector.load %arg16[%c0_75, %c0_76, %c0_77] : memref<1x2x32xf32, #tpu.memory_space<vmem>>, vector<1x1x32xf32>
      %148 = vector.shape_cast %147 : vector<1x1x32xf32> to vector<1x32xf32>
      %149 = vector.shape_cast %146 : vector<1x32xf32> to vector<1x1x32xf32>
      tpu.vector_store %arg16[%c0_75, %c0_76, %c0_77], %149 {strides = array<i32>} : memref<1x2x32xf32, #tpu.memory_space<vmem>>, vector<1x1x32xf32>,
      %150 = vector.extract_strided_slice %141 {offsets = [9, 0], sizes = [1, 32], strides = [1, 1]} : vector<18x32xf32> to vector<1x32xf32>
      %c0_78 = arith.constant 0 : index
      %c1_79 = arith.constant 1 : index
      %c0_80 = arith.constant 0 : index
      %151 = vector.load %arg16[%c0_78, %c1_79, %c0_80] : memref<1x2x32xf32, #tpu.memory_space<vmem>>, vector<1x1x32xf32>
      %152 = vector.shape_cast %151 : vector<1x1x32xf32> to vector<1x32xf32>
      %153 = vector.shape_cast %150 : vector<1x32xf32> to vector<1x1x32xf32>
      tpu.vector_store %arg16[%c0_78, %c1_79, %c0_80], %153 {strides = array<i32>} : memref<1x2x32xf32, #tpu.memory_space<vmem>>, vector<1x1x32xf32>,
    } else {
    }
    return
  }
  func.func @transform_0(%arg0: i32, %arg1: i32) -> (i32, i32) {
    %c0_i32 = arith.constant 0 : i32
    %c0_i32_0 = arith.constant 0 : i32
    return %arg0, %c0_i32 : i32, i32
  }
  func.func @transform_1(%arg0: i32, %arg1: i32) -> (i32, i32) {
    %c0_i32 = arith.constant 0 : i32
    %c0_i32_0 = arith.constant 0 : i32
    %c0_i32_1 = arith.constant 0 : i32
    return %c0_i32, %c0_i32_0 : i32, i32
  }
  func.func @transform_2(%arg0: i32, %arg1: i32) -> (i32, i32) {
    %c0_i32 = arith.constant 0 : i32
    %c0_i32_0 = arith.constant 0 : i32
    %c0_i32_1 = arith.constant 0 : i32
    return %c0_i32, %c0_i32_0 : i32, i32
  }
  func.func @transform_3(%arg0: i32, %arg1: i32) -> (i32, i32, i32) {
    %c0_i32 = arith.constant 0 : i32
    %c0_i32_0 = arith.constant 0 : i32
    %c0_i32_1 = arith.constant 0 : i32
    return %arg1, %c0_i32, %c0_i32_0 : i32, i32, i32
  }
  func.func @transform_4(%arg0: i32, %arg1: i32) -> (i32, i32, i32) {
    %c0_i32 = arith.constant 0 : i32
    %c0_i32_0 = arith.constant 0 : i32
    %c0_i32_1 = arith.constant 0 : i32
    return %arg1, %c0_i32, %c0_i32_0 : i32, i32, i32
  }
  func.func @transform_5(%arg0: i32, %arg1: i32) -> (i32, i32, i32) {
    %c0_i32 = arith.constant 0 : i32
    %c0_i32_0 = arith.constant 0 : i32
    %c0_i32_1 = arith.constant 0 : i32
    return %arg1, %c0_i32, %c0_i32_0 : i32, i32, i32
  }
  func.func @transform_6(%arg0: i32, %arg1: i32) -> (i32, i32, i32, i32) {
    %c0_i32 = arith.constant 0 : i32
    %c0_i32_0 = arith.constant 0 : i32
    %c0_i32_1 = arith.constant 0 : i32
    %c0_i32_2 = arith.constant 0 : i32
    return %arg1, %c0_i32, %c0_i32_0, %c0_i32_1 : i32, i32, i32, i32
  }
  func.func @transform_7(%arg0: i32, %arg1: i32) -> (i32, i32, i32) {
    %c0_i32 = arith.constant 0 : i32
    %c0_i32_0 = arith.constant 0 : i32
    %c0_i32_1 = arith.constant 0 : i32
    return %arg1, %c0_i32, %c0_i32_0 : i32, i32, i32
  }
  func.func @transform_8(%arg0: i32, %arg1: i32) -> (i32, i32, i32) {
    %c0_i32 = arith.constant 0 : i32
    %c0_i32_0 = arith.constant 0 : i32
    %c0_i32_1 = arith.constant 0 : i32
    return %arg1, %c0_i32, %c0_i32_0 : i32, i32, i32
  }
  func.func @transform_9(%arg0: i32, %arg1: i32) -> (i32, i32, i32) {
    %c0_i32 = arith.constant 0 : i32
    %c0_i32_0 = arith.constant 0 : i32
    %c0_i32_1 = arith.constant 0 : i32
    return %arg1, %c0_i32, %c0_i32_0 : i32, i32, i32
  }
  func.func @transform_10(%arg0: i32, %arg1: i32) -> (i32, i32, i32) {
    %c0_i32 = arith.constant 0 : i32
    %c0_i32_0 = arith.constant 0 : i32
    %c0_i32_1 = arith.constant 0 : i32
    return %arg1, %c0_i32, %c0_i32_0 : i32, i32, i32
  }
  func.func @transform_11(%arg0: i32, %arg1: i32) -> (i32, i32, i32) {
    %c0_i32 = arith.constant 0 : i32
    %c0_i32_0 = arith.constant 0 : i32
    %c0_i32_1 = arith.constant 0 : i32
    return %arg1, %c0_i32, %c0_i32_0 : i32, i32, i32
  }
  func.func @transform_12(%arg0: i32, %arg1: i32) -> (i32, i32, i32) {
    %c0_i32 = arith.constant 0 : i32
    %c0_i32_0 = arith.constant 0 : i32
    %c0_i32_1 = arith.constant 0 : i32
    return %arg1, %c0_i32, %c0_i32_0 : i32, i32, i32
  }
  func.func @transform_13(%arg0: i32, %arg1: i32) -> (i32, i32, i32) {
    %c0_i32 = arith.constant 0 : i32
    %c0_i32_0 = arith.constant 0 : i32
    %c0_i32_1 = arith.constant 0 : i32
    return %arg1, %c0_i32, %c0_i32_0 : i32, i32, i32
  }
  func.func @transform_14(%arg0: i32, %arg1: i32) -> (i32, i32, i32) {
    %c0_i32 = arith.constant 0 : i32
    %c0_i32_0 = arith.constant 0 : i32
    %c0_i32_1 = arith.constant 0 : i32
    return %arg0, %c0_i32, %c0_i32_0 : i32, i32, i32
  }
}

</mosaic_0001>

<bundles_post_ra>
// kernel: tpu_custom_call.1
= control target key start
LH: loop header
LB: loop body
LE: loop exit
PB: predicated region body
PF: predicated region fallthrough
CT: control target
= control target key end

     0   :  { %s2588_s0 = inlined_call_operand.hbm [shape: f32[18,32], index: 0, kind: input, shape index: {}]   ;;  %s2589_s1 = inlined_call_operand.vmem [shape: f32[18,1], index: 1, kind: input, shape index: {}]   ;;  %s2590_s2 = inlined_call_operand.hbm [shape: f32[1,18], index: 2, kind: input, shape index: {}]   ;;  %s2591_s3 = inlined_call_operand.vmem [shape: f32[2,1,32], index: 3, kind: input, shape index: {}]   ;;  %s2592_s4 = inlined_call_operand.vmem [shape: f32[2,1,32], index: 4, kind: input, shape index: {}]   ;;  %s2593_s5 = inlined_call_operand.vmem [shape: bf16[2,32,96], index: 5, kind: input, shape index: {}]   ;;  %s2594_s6 = inlined_call_operand.vmem [shape: bf16[2,2,16,32], index: 6, kind: input, shape index: {}]   ;;  %s2595_s7 = inlined_call_operand.vmem [shape: f32[2,1,32], index: 7, kind: input, shape index: {}]   ;;  %s2596_s8 = inlined_call_operand.vmem [shape: f32[2,1,32], index: 8, kind: input, shape index: {}]   ;;  %s2597_s9 = inlined_call_operand.vmem [shape: f32[2,1,32], index: 9, kind: input, shape index: {}]   ;;  %s2598_s10 = inlined_call_operand.vmem [shape: bf16[2,32,64], index: 10, kind: input, shape index: {}]   ;;  %s2599_s11 = inlined_call_operand.vmem [shape: f32[2,1,64], index: 11, kind: input, shape index: {}]   ;;  %s2600_s12 = inlined_call_operand.vmem [shape: bf16[2,64,32], index: 12, kind: input, shape index: {}]   ;;  %s2601_s13 = inlined_call_operand.vmem [shape: f32[2,1,32], index: 13, kind: input, shape index: {}]   ;;  %s2602_s14 = inlined_call_operand.hbm [shape: f32[1,2,32], index: 14, kind: output, shape index: {}]  }
   0x1   :  { %2606 = sst [smem:[#allocation15_spill]] %s2588_s0 }
   0x2   :  { %2607 = sst [smem:[#allocation16_spill]] %s2590_s2 }
   0x3   :  { %2608 = sst [smem:[#allocation17_spill]] %s2593_s5 }
   0x4   :  { %2609 = sst [smem:[#allocation18_spill]] %s2594_s6 }
   0x5   :  { %2610 = sst [smem:[#allocation19_spill]] %s2602_s14 }
   0x6   :  { %19 = vsyncpa [#allocation4], 0 }
   0x7   :  { %20 = vsyncpa [#allocation7], 0 }
   0x8   :  { %21 = vsyncpa [#allocation5], 0  ;;  %s2272_s29 = smov 0   ;;  %s2274_s30 = smov 0  }
   0x9   :  { %s2276_s15 = smov 0  }
   0xa LB: > { %2611 = sst [smem:[#allocation12_spill]] %s2179_s30  ;;  %s2603_s16 = sadd.s32 4294967295, %s2183_s15   ;;  %s2183_s15 = sphi %s2276_s15, %s27_s15   ;;  %s2179_s30 = sphi %s2274_s30, %s2631_s30   ;;  %s2175_s29 = sphi %s2272_s29, %s2630_s29  }
   0xb   : > { %2612 = sst [smem:[#allocation13_spill]] %s2183_s15  ;;  %s36_s17 = sadd.s32 1, %s2179_s30 }
   0xc   : > { %p37_p0 = scmp.ge.s32.totalorder %s36_s17, 2  ;;  %p1781_p1 = scmp.ge.s32.totalorder %s2183_s15, 1 }
   0xd   : > { %p424_p2 = scmp.lt.s32.totalorder %s2183_s15, 3  ;;  %p2299_p4 = scmp.eq.s32.totalorder %s2603_s16, 0 }
   0xe   : > { %s2633_s17 = smov (%p37_p0, %s36_s17), 0  ;;  %s2185_s20 = smov [#allocation3]  }
   0xf   : > { %2613 = sst [smem:[#allocation14_spill]] %s2633_s17  ;;  %p2293_p3 = pnand %p1781_p1, %p424_p2 }
  0x10   : > { %s439_s21 = sshll.u32 %s2185_s20, 4  ;;  %s2186_s23 = smov [#allocation6]   ;;  %s440_s21 = int_to_ptr.vmem [resolvable:$true] %s439_s21 }
  0x11   : > { %p1970_p5 = pneg %p2293_p3  ;;  %s456_s24 = sshll.u32 %s2186_s23, 4  ;;  %s457_s24 = int_to_ptr.vmem [resolvable:$true] %s456_s24 }
  0x12   : > { %s2084_s25 = scalar_lea.vmem %s440_s21, 384  ;;  %p2092_p11 = scmp.lt.s32.totalorder %s440_s21, %s440_s21 }
  0x13   : > { %p2307_p6 = pnand %p2299_p4, %p1970_p5  ;;  %p2085_p8 = scmp.ne.s32.totalorder %s440_s21, %s2084_s25 }
  0x14   : > { %p2093_p12 = scmp.lt.s32.totalorder %s2084_s25, %s2084_s25 }
  0x15   : > { %p2075_p7 = pneg %p2307_p6 }
  0x16   : > { %p2094_p13 = por %p2093_p12, %p2092_p11 }
  0x17   : > { %p2087_p9 = pnand %p2085_p8, %p2075_p7 }
  0x19   : > { %p2088_p10 = pneg %p2087_p9 }
  0x1b   : > { %p2095_p0 = pnand %p2094_p13, %p2088_p10 }
  0x1d   : > { %2098 = shalt.err (!%p2095_p0)
}
  0x1e   : > { %s2187_s26 = smov 128   ;;  %s2188_s27 = smov 8  }
  0x1f   : > { %s2617_s0 = sld [smem:[#allocation15_spill]]  ;;  %s2110_s23 = scalar_lea.vmem %s457_s24, 16 }
  0x20   : > { %p2111_p1 = scmp.ne.s32.totalorder %s457_s24, %s2110_s23  ;;  %s2117_s16 = scalar_lea.vmem %s457_s24, 32 }
  0x21   : > { %p2118_p8 = scmp.lt.s32.totalorder %s457_s24, %s457_s24  ;;  %p2119_p9 = scmp.lt.s32.totalorder %s2117_s16, %s2110_s23 }
  0x22   : > { %p2113_p2 = pnand %p2111_p1, %p2075_p7 }
  0x23   : > { %p2120_p10 = por %p2119_p9, %p2118_p8 }
  0x24   : > { %p2114_p5 = pneg %p2113_p2 }
  0x25   : > { %1973 = dma.hbm_to_vmem [thread:$0]  (!%p2307_p6), %s2617_s0, 384, %s440_s21, [#allocation4], %s2187_s26, %s2187_s26, %s2188_s27  }
  0x26   : > { %p2121_p11 = pnand %p2120_p10, %p2114_p5 }
  0x28   : > { %2124 = shalt.err (!%p2121_p11)
}
  0x29   : > { %s2618_s2 = sld [smem:[#allocation16_spill]] }
  0x2b   : > { %543 = sbr.rel (%p2293_p3) target bundleno = 2953 (0xb89), region = 76 }
  0x2f   : > { %1976 = dma.hbm_to_vmem [thread:$0]  (!%p2307_p6), %s2618_s2, 16, %s457_s24, [#allocation7]  }
  0x30   : > { %2162 = dma.done.wait (%p2299_p4), [#allocation4], 384  }
  0x31   : > { %2164 = vsyncadd (%p2299_p4), [#allocation4], 4294966912 }
  0x32   : > { %2166 = dma.done.wait (%p2299_p4), [#allocation7], 16  }
  0x33   : > { %2168 = vsyncadd (%p2299_p4), [#allocation7], 4294967280  ;;  %p625_p7 = scmp.lt.s32.totalorder %s2175_s29, 1  ;;  %s2619_s5 = sld [smem:[#allocation17_spill]] }
  0x34   : > { %s2620_s6 = sld [smem:[#allocation18_spill]]  ;;  %p1796_p3 = scmp.ne.s32.totalorder %s2175_s29, 0 }
  0x35   : > { %s2341_s16 = scalar_select %p625_p7, %s2175_s29, 1 }
  0x37   : > { %s1840_s26 = sshll.u32 %s2341_s16, 4  ;;  %s649_s14 = scalar_lea.vmem %s2597_s9, %s2341_s16 }
  0x38   : > { %s2377_s20 = scalar_lea.vmem %s2598_s10, %s1840_s26  ;;  %s1843_s0 = sshll.u32 %s2341_s16, 5 }
  0x39   : > { %s2359_s17 = scalar_lea.vmem %s2619_s5, %s1840_s26  ;;  %s657_s5 = scalar_lea.vmem %s2599_s11, %s2341_s16 }
  0x3a   : > { %s2364_s2 = scalar_lea.vmem %s2620_s6, %s1840_s26  ;;  %s665_s15 = scalar_lea.vmem %s2601_s13, %s2341_s16 }
  0x3b   : > { %s2391_s19 = scalar_lea.vmem %s2600_s12, %s1843_s0  ;;  %670 = sbr.rel (%p1796_p3) target bundleno = 67 (0x43), region = 88 }
  0x40   : > { %v671_v0 = vld [vmem:[#allocation3] sm:$0xff]  ;;  %vm674_vm0 = vcmask 261120   ;;  %v672_v1 = vld [vmem:[#allocation3 + $0x8] sm:$0xff]  ;;  %v673_v2 = vld [vmem:[#allocation3 + $0x10] sm:$0x3]  ;;  %vm677_vm1 = vcmask 254976  }
  0x41   : > { %675 = vst.msk [vmem:[#allocation2] sm:$0xff] %vm674_vm0, %v671_v0  ;;  %676 = vst.msk [vmem:[#allocation2 + $0x8] sm:$0xff] %vm674_vm0, %v672_v1 }
  0x42   : > { %678 = vst.msk [vmem:[#allocation2 + $0x10] sm:$0x3] %vm677_vm1, %v673_v2 }
  0x43 PF: > { %vm715_vm2 = vcmask 261120   ;;  %vm722_vm3 = vcmask 254976   ;;  %v2021_v24 = vld [vmem:[%s2359_s17 + $0x8] sm:$0xff]   ;;  %v2022_v25 = vld [vmem:[%s2359_s17] sm:$0xff]   ;;  %s2621_s26 = scalar_lea.vmem %s2591_s3, %s2341_s16  ;;  %s2622_s27 = scalar_lea.vmem %s2592_s4, %s2341_s16  ;;  %vm855_vm4 = vcmask 130048   ;;  %v2190_v58 = vmov 0  }
  0x44   : > { %1880 = vmatprep.subr.bf16.mxu1 %v2021_v24  ;;  %v1798_v37 = vld [vmem:[%s2621_s26] ss:$0 sm:$0xff]  ;;  %s2189_s28 = smov 96   ;;  %v684_v56 = vld [vmem:[%s2589_s1 + $0x10] sm:$0x3]  ;;  %2019 = vset.pattern.permute.xlu1 %v2190_v58  ;;  %v683_v60 = vld [vmem:[%s2589_s1 + $0x8] sm:$0xff]  ;;  %s2624_s23 = scalar_lea.vmem %s2596_s8, %s2341_s16 }
  0x45   : > { %1881 = vmatpush3.bf16.msra.mxu1 %v2021_v24  ;;  %v1799_v43 = vld [vmem:[%s2622_s27] ss:$0 sm:$0xff]  ;;  %2020 = vset.pattern.permute.xlu0 %v2190_v58  ;;  %v1797_v2 = vld [vmem:[#allocation6] ss:$0 sm:$0xff]  ;;  %vm922_vm6 = vcmask 146432   ;;  %vm929_vm9 = vcmask 140288   ;;  %s2623_s27 = scalar_lea.vmem %s2595_s7, %s2341_s16 }
  0x46   : > { %1882 = vmatprep.subr.bf16.mxu1 %v2022_v25  ;;  %v682_v59 = vld [vmem:[%s2589_s1] sm:$0xff]  ;;  %s2192_s6 = smov 64   ;;  %s2193_s24 = smov 112   ;;  %vm970_vm10 = vcmask 1040384   ;;  %vm1529_vm11 = vcmask 523264  }
  0x47   : > { %s2194_s26 = smov 80   ;;  %s2195_s17 = smov 48  }
  0x48   : > { %v2394_v3 = vld [vmem:[#allocation2] sm:$0xff]  ;;  %v2398_v5 = vld [vmem:[#allocation2 + $0x8] sm:$0xff]  ;;  %p1835_p4 = scmp.ne.s32.totalorder %s2175_s29, 1 }
  0x49   : > { %v2396_v4 = vld [vmem:[#allocation2 + $0x10] sm:$0x3]  ;;  %v716_v6 = vsel %vm715_vm2, %v2394_v3, 0.0  ;;  %v719_v8 = vsel %vm715_vm2, %v2398_v5, 0.0  ;;  %1883 = vmatpush3.bf16.msra.mxu1 %v2022_v25 }
  0x4a   : > { %v723_v7 = vsel %vm722_vm3, %v2396_v4, 0.0  ;;  %717 = vadd.xlane.f32.xlu0 %v716_v6 }
  0x4b   : > { %724 = vadd.xlane.f32.xlu1 %v723_v7 }
  0x4e   : > { %720 = vadd.xlane.f32.xlu0 %v719_v8  ;;  %v2191_v8 = vmov -1e+30  }
  0xd3   : > { %v718_v9 = vpop.xlane.xlu0 %717 }
  0xd4   : > { %v725_v10 = vpop.xlane.xlu1 %724  ;;  %v727_v11 = vmul.f32 0.03125, %v718_v9 }
  0xd5   : > { %v729_v12 = vmul.f32 0.03125, %v725_v10 }
  0xd6   : > { %v730_v13 = vsub.f32 %v2394_v3, %v727_v11 }
  0xd7   : > { %v732_v14 = vsub.f32 %v2396_v4, %v729_v12  ;;  %v721_v15 = vpop.xlane.xlu0 %720 }
  0xd8   : > { %v728_v16 = vmul.f32 0.03125, %v721_v15  ;;  %v733_v17 = vmul.f32 %v730_v13, %v730_v13 }
  0xd9   : > { %v735_v18 = vmul.f32 %v732_v14, %v732_v14 }
  0xda   : > { %v731_v19 = vsub.f32 %v2398_v5, %v728_v16  ;;  %v736_v20 = vsel %vm715_vm2, %v733_v17, 0.0 }
  0xdb   : > { %737 = vadd.xlane.f32.xlu1 %v736_v20  ;;  %v742_v21 = vsel %vm722_vm3, %v735_v18, 0.0 }
  0xdc   : > { %v734_v22 = vmul.f32 %v731_v19, %v731_v19 }
  0xde   : > { %v739_v23 = vsel %vm715_vm2, %v734_v22, 0.0 }
  0xdf   : > { %743 = vadd.xlane.f32.xlu1 %v742_v21  ;;  %740 = vadd.xlane.f32.xlu0 %v739_v23 }
 0x164   : > { %v738_v26 = vpop.xlane.xlu1 %737 }
 0x165   : > { %v745_v27 = vmul.f32 0.03125, %v738_v26 }
 0x167   : > { %v748_v28 = vadd.f32 1e-05, %v745_v27 }
 0x168   : > { %v744_v29 = vpop.xlane.xlu1 %743  ;;  %v741_v30 = vpop.xlane.xlu0 %740 }
 0x169   : > { %2031 = vrsqrt.f32 %v748_v28  ;;  %v747_v31 = vmul.f32 0.03125, %v744_v29  ;;  %v746_v32 = vmul.f32 0.03125, %v741_v30 }
 0x16b   : > { %v750_v33 = vadd.f32 1e-05, %v747_v31  ;;  %v749_v34 = vadd.f32 1e-05, %v746_v32 }
 0x16d   : > { %2033 = vrsqrt.f32 %v750_v33 }
 0x16e   : > { %2035 = vrsqrt.f32 %v749_v34 }
 0x176   : > { %v2032_v35 = vpop.eup %2031 }
 0x177   : > { %v754_v36 = vmul.f32 %v2032_v35, %v730_v13 }
 0x179   : > { %v763_v42 = vmul.f32 %v1798_v37, %v754_v36 }
 0x17a   : > { %v2034_v38 = vpop.eup %2033 }
 0x17b   : > { %v2036_v39 = vpop.eup %2035  ;;  %v756_v40 = vmul.f32 %v2034_v38, %v732_v14  ;;  %v772_v47 = vadd.f32 %v1799_v43, %v763_v42 }
 0x17c   : > { %v755_v41 = vmul.f32 %v2036_v39, %v731_v19 }
 0x17d   : > { %v765_v44 = vmul.f32 %v1798_v37, %v756_v40 }
 0x17e   : > { %v764_v45 = vmul.f32 %v1798_v37, %v755_v41 }
 0x17f   : > { %v774_v46 = vadd.f32 %v1799_v43, %v765_v44 }
 0x180   : > { %v773_v48 = vadd.f32 %v1799_v43, %v764_v45 }
 0x181   : > { %v776_v49 = vpack.c.bf16 %v774_v46, %v774_v46 }
 0x182   : > { %v775_v50 = vpack.c.bf16 %v773_v48, %v772_v47 }
 0x184   : > { %1884 = vmatprep.mubr.msk.bf16.mxu1 %vm715_vm2, %v775_v50 }
 0x185   : > { %1885 = vmatmul.mubr.msk.bf16.vlgmr.msra.gmra.mxu1 %vm715_vm2, %v776_v49 }
 0x245   : > { %v1886_v51 = vpop.f32.mrf.mxu1 }
 0x246   : > { %v2426_v52 = vpack.c.bf16 %v1886_v51, %v1886_v51 }
 0x247   : > { %v833_v53 = vpop.f32.mrf.mxu1 }
 0x248   : > { %853 = vrot.lane.b32.xlu0 %v2426_v52, %s2189_s28 }
 0x249   : > { %v1887_v54 = vpop.f32.mrf.mxu1 }
 0x24b   : > { %v836_v55 = vpop.f32.mrf.mxu1 }
 0x24c   : > { %v2432_v57 = vpack.c.bf16 %v836_v55, %v833_v53  ;;  %698 = vperm.xlu0 %2020, %v684_v56  }
 0x24e   : > { %851 = vrot.lane.b32.xlu1 %v2432_v57, %s2189_s28  ;;  %1892 = vmatprep.mubr.msk.bf16.mxu1 %vm855_vm4, %v2432_v57 }
 0x252   : > { %688 = vperm.xlu1 %2019, %v682_v59  }
 0x256   : > { %693 = vperm.xlu1 %2019, %v683_v60  }
 0x2ba   : > { %v854_v61 = vpop.permute.xlu0 %853 }
 0x2bb   : > { %v866_v62 = vsel %vm855_vm4, %v854_v61, 0  ;;  %1952 = vmatprep.subr.msk.bf16.mxu1 %vm855_vm4, %v854_v61 }
 0x2bc   : > { %1889 = vmatpush3.bf16.xpose.msra.mxu1 %v866_v62  ;;  %v2023_v62 = vld [vmem:[%s2364_s2] sm:$0xff]  }
 0x2c0   : > { %v852_v63 = vpop.permute.xlu1 %851 }
 0x2c1   : > { %1953 = vmatprep.subr.msk.bf16.mxu1 %vm855_vm4, %v852_v63  ;;  %v863_v0 = vsel %vm855_vm4, %v852_v63, 0 }
 0x2c4   : > { %1891 = vmatpush3.bf16.xpose.msra.mxu1 %v863_v0 }
 0x2c7   : > { %v699_v7 = vpop.permute.xlu0 %698 }
 0x2c8   : > { %vm709_vm7 = vcmp.eq.f32.partialorder %v699_v7, %v1797_v2 }
 0x2c9   : > { %v2453_v19 = vsel %vm709_vm7, 0.0, %v2191_v8 }
 0x2cb   : > { %1893 = vmatmul.mubr.msk.bf16.vlgmr.msra.gmra.mxu1 %vm855_vm4, %v2426_v52 }
 0x2cd   : > { %v689_v1 = vpop.permute.xlu1 %688 }
 0x2ce   : > { %vm707_vm5 = vcmp.eq.f32.partialorder %v689_v1, %v1797_v2 }
 0x2cf   : > { %v2449_v9 = vsel %vm707_vm5, 0.0, %v2191_v8 }
 0x2d1   : > { %v694_v10 = vpop.permute.xlu1 %693 }
 0x2d2   : > { %vm708_vm8 = vcmp.eq.f32.partialorder %v694_v10, %v1797_v2 }
 0x2d3   : > { %v2455_v20 = vsel %vm708_vm8, 0.0, %v2191_v8 }
 0x38b   : > { %v1894_v6 = vpop.f32.mrf.mxu1 }
 0x38c   : > { %v918_v16 = vmul.f32 0.25, %v1894_v6 }
 0x38d   : > { %v902_v11 = vpop.f32.mrf.mxu1 }
 0x38e   : > { %v916_v12 = vmul.f32 0.25, %v902_v11  ;;  %v921_v23 = vadd.f32 %v918_v16, %v2453_v19 }
 0x38f   : > { %v1895_v13 = vpop.f32.mrf.mxu1 }
 0x390   : > { %v919_v14 = vadd.f32 %v916_v12, %v2449_v9  ;;  %v930_v24 = vsel %vm929_vm9, %v921_v23, -inf }
 0x391   : > { %v905_v15 = vpop.f32.mrf.mxu1 }
 0x392   : > { %v917_v17 = vmul.f32 0.25, %v905_v15  ;;  %v923_v18 = vsel %vm922_vm6, %v919_v14, -inf }
 0x393   : > { %924 = vmax.xlane.f32.xlu1 %v923_v18 }
 0x394   : > { %v920_v21 = vadd.f32 %v917_v17, %v2455_v20 }
 0x396   : > { %v926_v22 = vsel %vm922_vm6, %v920_v21, -inf }
 0x397   : > { %927 = vmax.xlane.f32.xlu0 %v926_v22 }
 0x39b   : > { %931 = vmax.xlane.f32.xlu0 %v930_v24 }
 0x41c   : > { %v925_v25 = vpop.xlane.xlu1 %924 }
 0x41d   : > { %v933_v28 = vsub.f32 %v919_v14, %v925_v25 }
 0x41f   : > { %v936_v32 = vmul.f32 1.442695, %v933_v28 }
 0x420   : > { %v928_v26 = vpop.xlane.xlu0 %927 }
 0x421   : > { %v934_v27 = vsub.f32 %v920_v21, %v928_v26 }
 0x423   : > { %v938_v29 = vmul.f32 1.442695, %v934_v27 }
 0x424   : > { %v932_v30 = vpop.xlane.xlu0 %931 }
 0x425   : > { %2037 = vpow2.f32 %v938_v29  ;;  %v935_v31 = vsub.f32 %v921_v23, %v932_v30 }
 0x427   : > { %v940_v33 = vmul.f32 1.442695, %v935_v31 }
 0x429   : > { %2039 = vpow2.f32 %v940_v33 }
 0x42a   : > { %2041 = vpow2.f32 %v936_v32 }
 0x432   : > { %v2038_v34 = vpop.eup %2037 }
 0x433   : > { %v945_v35 = vsel %vm922_vm6, %v2038_v34, 0.0 }
 0x434   : > { %946 = vadd.xlane.f32.xlu0 %v945_v35 }
 0x436   : > { %v2040_v36 = vpop.eup %2039 }
 0x437   : > { %v948_v37 = vsel %vm929_vm9, %v2040_v36, 0.0  ;;  %v2042_v38 = vpop.eup %2041 }
 0x438   : > { %949 = vadd.xlane.f32.xlu1 %v948_v37  ;;  %v942_v39 = vsel %vm922_vm6, %v2042_v38, 0.0 }
 0x43c   : > { %943 = vadd.xlane.f32.xlu1 %v942_v39 }
 0x44a   : > { %961 = vrot.lane.b32.xlu0 %v2426_v52, %s2192_s6 }
 0x44d   : > { %959 = vrot.lane.b32.xlu1 %v2432_v57, %s2192_s6 }
 0x44e   : > { %1026 = vrot.lane.b32.xlu0 %v2432_v57, %s2193_s24 }
 0x451   : > { %1032 = vrot.lane.b32.xlu1 %v2426_v52, %s2194_s26 }
 0x455   : > { %1030 = vrot.lane.b32.xlu1 %v2432_v57, %s2194_s26 }
 0x459   : > { %1028 = vrot.lane.b32.xlu1 %v2426_v52, %s2193_s24 }
 0x4bd   : > { %v947_v40 = vpop.xlane.xlu0 %946 }
 0x4c1   : > { %v950_v41 = vpop.xlane.xlu1 %949  ;;  %v962_v42 = vpop.permute.xlu0 %961 }
 0x4c2   : > { %1954 = vmatprep.subr.msk.bf16.mxu0 %vm970_vm10, %v962_v42  ;;  %v972_v43 = vsel %vm970_vm10, %v962_v42, 0  ;;  %2043 = vrcp.f32 %v950_v41 }
 0x4c3   : > { %1897 = vmatpush3.bf16.msra.mxu0 %v972_v43  ;;  %2045 = vrcp.f32 %v947_v40 }
 0x4c5   : > { %v944_v44 = vpop.xlane.xlu1 %943  ;;  %v1027_v56 = vpop.permute.xlu0 %1026 }
 0x4c6   : > { %2047 = vrcp.f32 %v944_v44 }
 0x4c9   : > { %v960_v45 = vpop.permute.xlu1 %959 }
 0x4ca   : > { %1898 = vmatprep.subr.bf16.mxu0 %v960_v45 }
 0x4cb   : > { %1899 = vmatpush3.bf16.msra.mxu0 %v960_v45 }
 0x4cd   : > { %v1033_v46 = vpop.permute.xlu1 %1032 }
 0x4ce   : > { %1955 = vmatprep.subr.msk.bf16.mxu0 %vm855_vm4, %v1033_v46  ;;  %v1044_v58 = vsel %vm855_vm4, %v1033_v46, 0 }
 0x4cf   : > { %v2044_v47 = vpop.eup %2043 }
 0x4d0   : > { %v2046_v48 = vpop.eup %2045  ;;  %v956_v50 = vmul.f32 %v2044_v47, %v2040_v36 }
 0x4d1   : > { %v955_v53 = vmul.f32 %v2046_v48, %v2038_v34  ;;  %v1031_v59 = vpop.permute.xlu1 %1030 }
 0x4d2   : > { %v958_v55 = vpack.c.bf16 %v956_v50, %v956_v50  ;;  %v1041_v60 = vsel %vm855_vm4, %v1031_v59, 0 }
 0x4d3   : > { %v2048_v49 = vpop.eup %2047 }
 0x4d4   : > { %v954_v51 = vmul.f32 %v2048_v49, %v2042_v38 }
 0x4d5   : > { %v1029_v61 = vpop.permute.xlu1 %1028 }
 0x4d6   : > { %v957_v54 = vpack.c.bf16 %v955_v53, %v954_v51  ;;  %v2024_v51 = vld [vmem:[%s2364_s2 + $0x8] sm:$0xff]  }
 0x4d8   : > { %1900 = vmatprep.mubr.msk.bf16.mxu0 %vm922_vm6, %v957_v54 }
 0x4d9   : > { %1901 = vmatmul.mubr.msk.bf16.vlgmr.msra.gmra.mxu0 %vm922_vm6, %v958_v55 }
 0x4da   : > { %1905 = vmatpush3.bf16.xpose.msra.mxu0 %v1044_v58  ;;  %1908 = vmatprep.mubr.msk.bf16.mxu0 %vm855_vm4, %v1027_v56 }
 0x4db   : > { %1956 = vmatprep.subr.msk.bf16.mxu0 %vm855_vm4, %v1031_v59 }
 0x4e2   : > { %1907 = vmatpush3.bf16.xpose.msra.mxu0 %v1041_v60 }
 0x4e3   : > { %1926 = vmatprep.subr.bf16.mxu0 %v2023_v62 }
 0x4e9   : > { %1909 = vmatmul.mubr.msk.bf16.vlgmr.msra.gmra.mxu0 %vm855_vm4, %v1029_v61 }
 0x4ea   : > { %1927 = vmatpush3.bf16.msra.mxu0 %v2023_v62 }
 0x599   : > { %v1902_v63 = vpop.f32.mrf.mxu0 }
 0x59a   : > { %v1023_v7 = vpack.c.bf16 %v1902_v63, %v1902_v63 }
 0x59b   : > { %v1008_v0 = vpop.f32.mrf.mxu0 }
 0x59d   : > { %v1903_v1 = vpop.f32.mrf.mxu0 }
 0x59f   : > { %v1011_v2 = vpop.f32.mrf.mxu0 }
 0x5a0   : > { %v1022_v6 = vpack.c.bf16 %v1011_v2, %v1008_v0 }
 0x5a2   : > { %1928 = vmatprep.mubr.msk.bf16.mxu0 %vm855_vm4, %v1022_v6  ;;  %v1820_v6 = vld [vmem:[%s2623_s27] ss:$0 sm:$0xff] }
 0x5a3   : > { %1929 = vmatmul.mubr.msk.bf16.vlgmr.msra.gmra.mxu0 %vm855_vm4, %v1023_v7 }
 0x5a9   : > { %v1910_v8 = vpop.f32.mrf.mxu0 }
 0x5aa   : > { %v1096_v11 = vmul.f32 0.25, %v1910_v8 }
 0x5ab   : > { %v1080_v10 = vpop.f32.mrf.mxu0 }
 0x5ac   : > { %v1094_v12 = vmul.f32 0.25, %v1080_v10  ;;  %v1099_v18 = vadd.f32 %v1096_v11, %v2453_v19 }
 0x5ad   : > { %v1911_v13 = vpop.f32.mrf.mxu0 }
 0x5ae   : > { %v1097_v14 = vadd.f32 %v1094_v12, %v2449_v9  ;;  %v1106_v22 = vsel %vm929_vm9, %v1099_v18, -inf }
 0x5af   : > { %v1083_v15 = vpop.f32.mrf.mxu0 }
 0x5b0   : > { %v1095_v16 = vmul.f32 0.25, %v1083_v15  ;;  %v1100_v17 = vsel %vm922_vm6, %v1097_v14, -inf }
 0x5b1   : > { %1101 = vmax.xlane.f32.xlu0 %v1100_v17 }
 0x5b2   : > { %v1098_v21 = vadd.f32 %v1095_v16, %v2455_v20 }
 0x5b4   : > { %v1103_v23 = vsel %vm922_vm6, %v1098_v21, -inf }
 0x5b5   : > { %1107 = vmax.xlane.f32.xlu0 %v1106_v22  ;;  %1104 = vmax.xlane.f32.xlu1 %v1103_v23 }
 0x63a   : > { %v1102_v24 = vpop.xlane.xlu0 %1101 }
 0x63b   : > { %v1109_v25 = vsub.f32 %v1097_v14, %v1102_v24 }
 0x63d   : > { %v1112_v26 = vmul.f32 1.442695, %v1109_v25 }
 0x63e   : > { %v1108_v27 = vpop.xlane.xlu0 %1107  ;;  %v1105_v9 = vpop.xlane.xlu1 %1104 }
 0x63f   : > { %2049 = vpow2.f32 %v1112_v26  ;;  %v1111_v28 = vsub.f32 %v1099_v18, %v1108_v27  ;;  %v1110_v29 = vsub.f32 %v1098_v21, %v1105_v9 }
 0x641   : > { %v1116_v30 = vmul.f32 1.442695, %v1111_v28  ;;  %v1114_v31 = vmul.f32 1.442695, %v1110_v29 }
 0x643   : > { %2051 = vpow2.f32 %v1116_v30 }
 0x644   : > { %2053 = vpow2.f32 %v1114_v31  ;;  %v2025_v31 = vld [vmem:[%s2377_s20 + $0x8] sm:$0xff]  }
 0x64c   : > { %v2050_v19 = vpop.eup %2049 }
 0x64d   : > { %v1118_v20 = vsel %vm922_vm6, %v2050_v19, 0.0 }
 0x64e   : > { %1119 = vadd.xlane.f32.xlu0 %v1118_v20 }
 0x650   : > { %v2052_v32 = vpop.eup %2051 }
 0x651   : > { %v2054_v33 = vpop.eup %2053  ;;  %v1124_v34 = vsel %vm929_vm9, %v2052_v32, 0.0 }
 0x652   : > { %1125 = vadd.xlane.f32.xlu1 %v1124_v34  ;;  %v1121_v35 = vsel %vm922_vm6, %v2054_v33, 0.0 }
 0x653   : > { %1122 = vadd.xlane.f32.xlu0 %v1121_v35 }
 0x663   : > { %1135 = vrot.lane.b32.xlu1 %v2432_v57, %s2195_s17  ;;  %v1930_v36 = vpop.f32.mrf.mxu0 }
 0x665   : > { %v1308_v37 = vpop.f32.mrf.mxu0 }
 0x667   : > { %v1931_v38 = vpop.f32.mrf.mxu0 }
 0x669   : > { %1137 = vrot.lane.b32.xlu0 %v2426_v52, %s2195_s17  ;;  %v1311_v2 = vpop.f32.mrf.mxu0 }
 0x6d7   : > { %v1120_v39 = vpop.xlane.xlu0 %1119 }
 0x6d8   : > { %2055 = vrcp.f32 %v1120_v39 }
 0x6db   : > { %v1126_v40 = vpop.xlane.xlu1 %1125 }
 0x6dc   : > { %v1123_v41 = vpop.xlane.xlu0 %1122  ;;  %2057 = vrcp.f32 %v1126_v40 }
 0x6dd   : > { %2059 = vrcp.f32 %v1123_v41 }
 0x6df   : > { %v1136_v44 = vpop.permute.xlu1 %1135 }
 0x6e0   : > { %v1138_v42 = vpop.permute.xlu0 %1137 }
 0x6e1   : > { %v1147_v43 = vsel %vm970_vm10, %v1138_v42, 0  ;;  %1957 = vmatprep.subr.msk.bf16.mxu1 %vm970_vm10, %v1138_v42  ;;  %v1821_v42 = vld [vmem:[%s2624_s23] ss:$0 sm:$0xff] }
 0x6e2   : > { %1913 = vmatpush3.bf16.msra.mxu1 %v1147_v43 }
 0x6e3   : > { %1914 = vmatprep.subr.bf16.mxu1 %v1136_v44 }
 0x6e5   : > { %v2056_v57 = vpop.eup %2055 }
 0x6e6   : > { %1915 = vmatpush3.bf16.msra.mxu1 %v1136_v44  ;;  %v1130_v47 = vmul.f32 %v2056_v57, %v2050_v19  ;;  %v2026_v19 = vld [vmem:[%s2377_s20] sm:$0xff]  }
 0x6e7   : > { %1920 = vmatprep.subr.bf16.mxu1 %v2024_v51 }
 0x6e9   : > { %v2058_v45 = vpop.eup %2057 }
 0x6ea   : > { %v2060_v46 = vpop.eup %2059  ;;  %v1132_v52 = vmul.f32 %v2058_v45, %v2052_v32  ;;  %v1822_v45 = vld [vmem:[%s649_s14] ss:$0 sm:$0xff] }
 0x6eb   : > { %v1131_v48 = vmul.f32 %v2060_v46, %v2054_v33 }
 0x6ec   : > { %v1134_v49 = vpack.c.bf16 %v1132_v52, %v1132_v52 }
 0x6ed   : > { %v1133_v50 = vpack.c.bf16 %v1131_v48, %v1130_v47 }
 0x6ef   : > { %1916 = vmatprep.mubr.msk.bf16.mxu1 %vm922_vm6, %v1133_v50 }
 0x6f0   : > { %1917 = vmatmul.mubr.msk.bf16.vlgmr.msra.gmra.mxu1 %vm922_vm6, %v1134_v49 }
 0x6f1   : > { %1921 = vmatpush3.bf16.msra.mxu1 %v2024_v51 }
 0x6f2   : > { %1932 = vmatprep.subr.bf16.mxu1 %v2025_v31 }
 0x7b0   : > { %v1918_v53 = vpop.f32.mrf.mxu1 }
 0x7b1   : > { %v1198_v59 = vpack.c.bf16 %v1918_v53, %v1918_v53 }
 0x7b2   : > { %v1183_v54 = vpop.f32.mrf.mxu1 }
 0x7b4   : > { %v1919_v55 = vpop.f32.mrf.mxu1 }
 0x7b5   : > { %v2027_v55 = vld [vmem:[%s2391_s19 + $0x18] sm:$0xff]  }
 0x7b6   : > { %v1186_v56 = vpop.f32.mrf.mxu1  ;;  %1940 = vmatprep.subr.bf16.mxu0 %v2027_v55 }
 0x7b7   : > { %v1197_v58 = vpack.c.bf16 %v1186_v56, %v1183_v54  ;;  %1941 = vmatpush3.bf16.msra.mxu0 %v2027_v55  ;;  %v2028_v56 = vld [vmem:[%s2391_s19 + $0x10] sm:$0xff]  }
 0x7b8   : > { %1942 = vmatprep.subr.bf16.mxu0 %v2028_v56 }
 0x7b9   : > { %1922 = vmatprep.mubr.msk.bf16.mxu1 %vm855_vm4, %v1197_v58  ;;  %v2029_v58 = vld [vmem:[%s2391_s19 + $0x8] sm:$0xff]  }
 0x7ba   : > { %1923 = vmatmul.mubr.msk.bf16.vlgmr.msra.gmra.mxu1 %vm855_vm4, %v1198_v59  ;;  %v2030_v59 = vld [vmem:[%s2391_s19] sm:$0xff]  }
 0x7bb   : > { %1933 = vmatpush3.bf16.msra.mxu1 %v2025_v31  ;;  %1943 = vmatpush3.bf16.msra.mxu0 %v2028_v56 }
 0x7bc   : > { %1934 = vmatprep.subr.bf16.mxu1 %v2026_v19  ;;  %1944 = vmatprep.subr.bf16.mxu0 %v2029_v58 }
 0x7bf   : > { %1935 = vmatpush3.bf16.msra.mxu1 %v2026_v19  ;;  %1945 = vmatpush3.bf16.msra.mxu0 %v2029_v58 }
 0x7c0   : > { %1946 = vmatprep.subr.bf16.mxu0 %v2030_v59 }
 0x7c3   : > { %1947 = vmatpush3.bf16.msra.mxu0 %v2030_v59 }
 0x87a   : > { %v1924_v60 = vpop.f32.mrf.mxu1 }
 0x87b   : > { %v1317_v0 = vadd.f32 %v1930_v36, %v1924_v60  ;;  %v1823_v60 = vld [vmem:[%s657_s5] ss:$0 sm:$0xff] }
 0x87c   : > { %v1248_v61 = vpop.f32.mrf.mxu1 }
 0x87d   : > { %v1309_v62 = vadd.f32 %v1308_v37, %v1248_v61  ;;  %v1324_v11 = vadd.f32 %v1317_v0, %v2396_v4 }
 0x87e   : > { %v1925_v63 = vpop.f32.mrf.mxu1 }
 0x87f   : > { %v1322_v1 = vadd.f32 %v1309_v62, %v2394_v3  ;;  %v2515_v3 = vadd.f32 %v1820_v6, %v1324_v11 }
 0x880   : > { %v1251_v7 = vpop.f32.mrf.mxu1 }
 0x881   : > { %v2507_v8 = vadd.f32 %v1820_v6, %v1322_v1  ;;  %v1312_v10 = vadd.f32 %v1311_v2, %v1251_v7  ;;  %v1343_v16 = vsel %vm722_vm3, %v2515_v3, 0.0 }
 0x883   : > { %v1323_v12 = vadd.f32 %v1312_v10, %v2398_v5  ;;  %v1337_v13 = vsel %vm715_vm2, %v2507_v8, 0.0 }
 0x884   : > { %1338 = vadd.xlane.f32.xlu1 %v1337_v13 }
 0x885   : > { %v2513_v14 = vadd.f32 %v1820_v6, %v1323_v12 }
 0x887   : > { %v1340_v15 = vsel %vm715_vm2, %v2513_v14, 0.0 }
 0x888   : > { %1341 = vadd.xlane.f32.xlu0 %v1340_v15 }
 0x88c   : > { %1344 = vadd.xlane.f32.xlu0 %v1343_v16 }
 0x90d   : > { %v1339_v17 = vpop.xlane.xlu1 %1338 }
 0x90e   : > { %v1346_v4 = vmul.f32 0.03125, %v1339_v17 }
 0x910   : > { %v1349_v5 = vsub.f32 %v2507_v8, %v1346_v4 }
 0x911   : > { %v1342_v18 = vpop.xlane.xlu0 %1341 }
 0x912   : > { %v1347_v21 = vmul.f32 0.03125, %v1342_v18  ;;  %v1352_v22 = vmul.f32 %v1349_v5, %v1349_v5 }
 0x914   : > { %v1350_v23 = vsub.f32 %v2513_v14, %v1347_v21  ;;  %v1355_v24 = vsel %vm715_vm2, %v1352_v22, 0.0 }
 0x915   : > { %1356 = vadd.xlane.f32.xlu1 %v1355_v24  ;;  %v1345_v25 = vpop.xlane.xlu0 %1344 }
 0x916   : > { %v1348_v26 = vmul.f32 0.03125, %v1345_v25  ;;  %v1353_v27 = vmul.f32 %v1350_v23, %v1350_v23 }
 0x918   : > { %v1351_v9 = vsub.f32 %v2515_v3, %v1348_v26  ;;  %v1358_v28 = vsel %vm715_vm2, %v1353_v27, 0.0  ;;  %v1828_v27 = vld [vmem:[%s665_s15] ss:$0 sm:$0xff] }
 0x919   : > { %1359 = vadd.xlane.f32.xlu0 %v1358_v28 }
 0x91a   : > { %v1354_v29 = vmul.f32 %v1351_v9, %v1351_v9 }
 0x91c   : > { %v1361_v30 = vsel %vm722_vm3, %v1354_v29, 0.0 }
 0x91d   : > { %1362 = vadd.xlane.f32.xlu1 %v1361_v30 }
 0x99e   : > { %v1357_v20 = vpop.xlane.xlu1 %1356 }
 0x99f   : > { %v1364_v32 = vmul.f32 0.03125, %v1357_v20 }
 0x9a1   : > { %v1367_v33 = vadd.f32 1e-05, %v1364_v32 }
 0x9a2   : > { %v1360_v34 = vpop.xlane.xlu0 %1359 }
 0x9a3   : > { %2061 = vrsqrt.f32 %v1367_v33  ;;  %v1365_v35 = vmul.f32 0.03125, %v1360_v34 }
 0x9a5   : > { %v1368_v36 = vadd.f32 1e-05, %v1365_v35 }
 0x9a6   : > { %v1363_v37 = vpop.xlane.xlu1 %1362 }
 0x9a7   : > { %2063 = vrsqrt.f32 %v1368_v36  ;;  %v1366_v38 = vmul.f32 0.03125, %v1363_v37 }
 0x9a9   : > { %v1369_v39 = vadd.f32 1e-05, %v1366_v38 }
 0x9ab   : > { %2065 = vrsqrt.f32 %v1369_v39 }
 0x9b0   : > { %v2062_v40 = vpop.eup %2061 }
 0x9b1   : > { %v1373_v41 = vmul.f32 %v2062_v40, %v1349_v5 }
 0x9b3   : > { %v1382_v57 = vmul.f32 %v1821_v42, %v1373_v41 }
 0x9b4   : > { %v2064_v43 = vpop.eup %2063 }
 0x9b5   : > { %v1374_v44 = vmul.f32 %v2064_v43, %v1350_v23  ;;  %v1391_v48 = vadd.f32 %v1822_v45, %v1382_v57 }
 0x9b7   : > { %v1383_v46 = vmul.f32 %v1821_v42, %v1374_v44 }
 0x9b8   : > { %v2066_v52 = vpop.eup %2065 }
 0x9b9   : > { %v1375_v47 = vmul.f32 %v2066_v52, %v1351_v9  ;;  %v1392_v49 = vadd.f32 %v1822_v45, %v1383_v46 }
 0x9bb   : > { %v1394_v50 = vpack.c.bf16 %v1392_v49, %v1391_v48  ;;  %v1384_v51 = vmul.f32 %v1821_v42, %v1375_v47 }
 0x9bd   : > { %1936 = vmatprep.mubr.msk.bf16.mxu1 %vm715_vm2, %v1394_v50  ;;  %v1393_v53 = vadd.f32 %v1822_v45, %v1384_v51 }
 0x9bf   : > { %v1395_v54 = vpack.c.bf16 %v1393_v53, %v1393_v53 }
 0x9c1   : > { %1937 = vmatmul.mubr.msk.bf16.vlgmr.msra.gmra.mxu1 %vm715_vm2, %v1395_v54 }
 0xa81   : > { %v1938_v61 = vpop.f32.mrf.mxu1 }
 0xa82   : > { %v1468_v62 = vadd.f32 %v1938_v61, %v1823_v60 }
 0xa83   : > { %v1459_v63 = vpop.f32.mrf.mxu1 }
 0xa84   : > { %v1478_v0 = vmul.f32 0.70710677, %v1468_v62  ;;  %v1460_v1 = vadd.f32 %v1823_v60, %v1459_v63  ;;  %v1475_v4 = vmul.f32 0.5, %v1468_v62 }
 0xa85   : > { %v1939_v2 = vpop.f32.mrf.mxu1 }
 0xa86   : > { %v1476_v6 = vmul.f32 0.70710677, %v1460_v1  ;;  %2067 = verf.f32 %v1478_v0  ;;  %v1473_v5 = vmul.f32 0.5, %v1460_v1 }
 0xa87   : > { %v1462_v7 = vpop.f32.mrf.mxu1 }
 0xa88   : > { %2069 = verf.f32 %v1476_v6  ;;  %v1463_v10 = vadd.f32 %v1823_v60, %v1462_v7 }
 0xa8a   : > { %v1477_v11 = vmul.f32 0.70710677, %v1463_v10  ;;  %v1474_v18 = vmul.f32 0.5, %v1463_v10 }
 0xa8c   : > { %2071 = verf.f32 %v1477_v11 }
 0xa93   : > { %v2068_v12 = vpop.eup %2067 }
 0xa94   : > { %v1484_v15 = vadd.f32 1.0, %v2068_v12 }
 0xa95   : > { %v2070_v13 = vpop.eup %2069 }
 0xa96   : > { %v1482_v16 = vadd.f32 1.0, %v2070_v13  ;;  %v1487_v22 = vmul.f32 %v1484_v15, %v1475_v4 }
 0xa98   : > { %v1485_v23 = vmul.f32 %v1482_v16, %v1473_v5  ;;  %v1489_v26 = vpack.c.bf16 %v1487_v22, %v1487_v22 }
 0xa99   : > { %v2072_v17 = vpop.eup %2071 }
 0xa9a   : > { %v1483_v21 = vadd.f32 1.0, %v2072_v17 }
 0xa9c   : > { %v1486_v24 = vmul.f32 %v1483_v21, %v1474_v18 }
 0xa9e   : > { %v1488_v25 = vpack.c.bf16 %v1486_v24, %v1485_v23 }
 0xaa0   : > { %1948 = vmatprep.mubr.msk.bf16.mxu0 %vm1529_vm11, %v1488_v25 }
 0xaa1   : > { %1949 = vmatmul.mubr.msk.bf16.vlgmr.msra.gmra.mxu0 %vm1529_vm11, %v1489_v26 }
 0xb61   : > { %v1950_v9 = vpop.f32.mrf.mxu0 }
 0xb62   : > { %v1579_v28 = vadd.f32 %v1950_v9, %v1828_v27 }
 0xb63   : > { %v1570_v29 = vpop.f32.mrf.mxu0 }
 0xb64   : > { %v1586_v30 = vadd.f32 %v1579_v28, %v2515_v3  ;;  %v1571_v31 = vadd.f32 %v1828_v27, %v1570_v29 }
 0xb65   : > { %v1951_v19 = vpop.f32.mrf.mxu0 }
 0xb66   : > { %1589 = vst.msk [vmem:[#allocation2 + $0x10] sm:$0x3] %vm722_vm3, %v1586_v30  ;;  %v1584_v20 = vadd.f32 %v1571_v31, %v2507_v8 }
 0xb67   : > { %v1573_v32 = vpop.f32.mrf.mxu0 }
 0xb68   : > { %1587 = vst.msk [vmem:[#allocation2] sm:$0xff] %vm715_vm2, %v1584_v20  ;;  %v1574_v33 = vadd.f32 %v1828_v27, %v1573_v32  ;;  %1593 = sbr.rel (%p1835_p4) target bundleno = 2928 (0xb70), region = 92 }
 0xb6a   : > { %v1585_v34 = vadd.f32 %v1574_v33, %v2513_v14 }
 0xb6c   : > { %1588 = vst.msk [vmem:[#allocation2 + $0x8] sm:$0xff] %vm715_vm2, %v1585_v34 }
 0xb6d   : > { %vm1594_vm12 = vcmask 253952   ;;  %vm1596_vm13 = vcmask 254977  }
 0xb6e   : > { %1595 = vst.msk [vmem:[#allocation8] sm:$0x1] %vm1594_vm12, %v1584_v20 }
 0xb6f   : > { %1597 = vst.msk [vmem:[#allocation8] sm:$0x2] %vm1596_vm13, %v1585_v34 }
 0xb70 PF: > { %s2625_s15 = sld [smem:[#allocation13_spill]]  ;;  %s2196_s21 = smov [#allocation8]  }
 0xb71   : > { %s1607_s6 = sshll.u32 %s2196_s21, 4  ;;  %s1608_s6 = int_to_ptr.vmem [resolvable:$true] %s1607_s6 }
 0xb72   : > { %s2125_s24 = scalar_lea.vmem %s1608_s6, 32  ;;  %p2132_p1 = scmp.lt.s32.totalorder %s1608_s6, %s1608_s6 }
 0xb73   : > { %p2126_p12 = scmp.ne.s32.totalorder %s1608_s6, %s2125_s24  ;;  %p2133_p2 = scmp.lt.s32.totalorder %s2125_s24, %s2125_s24 }
 0xb75   : > { %p2134_p5 = por %p2133_p2, %p2132_p1 }
 0xb76   : > { %s2626_s16 = sadd.s32 4294967295, %s2625_s15  }
 0xb77   : > { %p2564_p6 = scmp.eq.s32.totalorder %s2626_s16, 1 }
 0xb79   : > { %p2127_p13 = pnand %p2126_p12, %p2564_p6 }
 0xb7b   : > { %p2128_p0 = pneg %p2127_p13 }
 0xb7d   : > { %p2135_p8 = pnand %p2134_p5, %p2128_p0 }
 0xb7f   : > { %2138 = shalt.err (!%p2135_p8)
}
 0xb80   : > { %s2628_s17 = sld [smem:[#allocation19_spill]] }
 0xb86   : > { %1967 = dma.vmem_to_hbm [thread:$0]  (%p2564_p6), %s1608_s6, 32, %s2628_s17, [#allocation5]  }
 0xb87   : > { %2170 = dma.done.wait (%p2564_p6), [#allocation5], 32  }
 0xb88   : > { %2172 = vsyncadd (%p2564_p6), [#allocation5], 4294967264 }
 0xb89 PF: > { %s2629_s2 = sld [smem:[#allocation13_spill]] }
 0xb8a   : > { %s2630_s29 = sld [smem:[#allocation12_spill]] }
 0xb8b   : > { %s2631_s30 = sld [smem:[#allocation14_spill]] }
 0xb8f   : > { %s27_s15 = sadd.s32 1, %s2629_s2  }
 0xb90   : > { %p24_p9 = scmp.ge.s32.totalorder %s27_s15, 4  }
 0xb92   :  { %26 = sbr.rel (!%p24_p9) target bundleno = 10 (0xa), region = 153 }
 0xb97   :  { %1620 = vsyncpa [#allocation4], 1 }
 0xb98   :  { %1622 = vsyncpa [#allocation4 + $0x1], 1 }
 0xb99   :  { %1623 = vsyncpa [#allocation7], 1 }
 0xb9a   :  { %1624 = vsyncpa [#allocation5], 1 }
 0xb9b   :  { %1626 = vsyncpa [#allocation5 + $0x1], 1 }

</bundles_post_ra>
